<compile_context>
chip_gen: v6e
topology: v6e:2x2x1
jax: 0.10.0
libtpu: 0.0.40
codegen_flags: <defaults>
</compile_context>

<pallas_src>
import jax
import jax.numpy as jnp
from jax.experimental import pallas as pl
from jax.experimental.pallas import tpu as pltpu


# ----------------------------------------------------------------------------
# Random mask-id generation (torch.rand + argsort equivalent).
# TODO(synk): sorting has no clean Pallas TPU equivalent; it stays in the JAX
# wrapper (semantics -- uniformly random permutations -- are preserved).
# ----------------------------------------------------------------------------
def _make_mask_ids(key, B, N, n, M, m):
    k1, k2 = jax.random.split(key)
    noise_s = jax.random.uniform(k1, (B, N))
    ids_shuffle = jnp.argsort(noise_s, axis=1)
    ids_restore = jnp.argsort(ids_shuffle, axis=1)
    ids_keep = ids_shuffle[:, :n]
    ids_drop = ids_shuffle[:, n:]
    noise_p = jax.random.uniform(k2, (B, n, M))
    ids_keep_p = jnp.argsort(noise_p, axis=2)[:, :, :m]
    return ids_keep, ids_drop, ids_restore, ids_keep_p


# ----------------------------------------------------------------------------
# VMEM budgeting / group-size choice.
# ----------------------------------------------------------------------------
def _per_step_vmem_bytes(G, m, M, Kp, E):
    return (2 * G * M * Kp * 2        # patches block, bf16, double-buffered
            + 2 * G * m * 128 * 4     # ids block (lane-padded i32), double-buffered
            + 2 * Kp * E * 2          # conv weight, bf16
            + 2 * M * E * 2           # pos table, bf16
            + 2 * 8 * 128 * 4         # bias (tile-padded)
            + G * m * Kp * 2          # staging scratch, bf16
            + 2 * G * m * E * 4)      # output block, f32, double-buffered


def _choose_group_size(n, m, M, Kp, E, *, target_rows=256, vmem_budget=40 << 20):
    """Largest group of kept slices per grid step s.t. G | n, G*m is (preferably)
    a multiple of 8, and the per-step VMEM footprint fits even v7x (64 MiB)."""
    divisors = [g for g in range(1, n + 1) if n % g == 0]
    fitting = [g for g in divisors
               if _per_step_vmem_bytes(g, m, M, Kp, E) <= vmem_budget] or [1]
    aligned = [g for g in fitting if (g * m) % 8 == 0]
    cands = aligned or fitting
    for g in cands:
        if g * m >= target_rows:
            return g
    return cands[-1]


# ----------------------------------------------------------------------------
# Pallas kernel: one grid step = one group of G kept slices of one batch elem.
# ----------------------------------------------------------------------------
def _patch_embed_kernel(patches_ref, ids_ref, wk_ref, bias_ref, pos_ref,
                        o_ref, pk_ref):
    """patches_ref : (1, 1, G, M, Kp) bf16 -- all M patches of each group slice
       ids_ref     : (1, 1, G*m, 1)   i32  -- kept-patch ids (inner mask), stacked
       wk_ref      : (Kp, E)          bf16 -- conv weight, pre-transposed (x @ W)
       bias_ref    : (1, E)           f32
       pos_ref     : (M, E)           bf16 -- inner positional-embedding table
       o_ref       : (1, 1, G*m, E)   f32
       pk_ref      : (G*m, Kp)        bf16 -- staging scratch for kept patches"""
    G, M = patches_ref.shape[2], patches_ref.shape[3]
    Gm = pk_ref.shape[0]
    m = Gm // G

    # One-hot selector rows sel[r, p] = (p == kept_patch_id[r]); standard
    # (rows, M) orientation so both selection dots are plain (rows, M) @ (M, .)
    # MXU matmuls -- no dynamic addressing, no transposed-LHS layout pass.
    ids = ids_ref[0, 0]                                             # (G*m, 1)
    patch_iota = jax.lax.broadcasted_iota(jnp.int32, (Gm, M), 1)
    sel = (patch_iota == ids).astype(jnp.bfloat16)                  # (G*m, M)

    # Positional-embedding gather for the whole group in one MXU matmul against
    # the shared (M, E) table (one-hot selection of bf16 values is exact).
    pos_kept = jnp.dot(sel, pos_ref[...], preferred_element_type=jnp.float32)

    # Inner-mask gather: stage every slice's kept patches into one scratch.
    for g in range(G):                    # static unroll, G is small
        kept = jnp.dot(sel[g * m:(g + 1) * m, :], patches_ref[0, 0, g],
                       preferred_element_type=jnp.float32)          # (m, Kp)
        pk_ref[g * m:(g + 1) * m, :] = kept.astype(jnp.bfloat16)

    # Patch embedding for the whole group: ONE (G*m, Kp) @ (Kp, E) MXU matmul
    # (conv with kernel=stride=patch == linear over the flattened patch).
    y = jnp.dot(pk_ref[...], wk_ref[...], preferred_element_type=jnp.float32)
    o_ref[0, 0] = (y + bias_ref[...] + pos_kept).astype(o_ref.dtype)


def patch_embed_pallas(img, ids_keep, ids_keep_p, w_conv, b_conv, inner_pos, *,
                       patch_size):
    """img: (B, C, N, W, H); ids_keep: (B, n); ids_keep_p: (B, n, m);
    w_conv: (E, C, w, h) [nn.Conv2d layout]; b_conv: (E,); inner_pos: (1, M, E)."""
    B, C, N, W, H = img.shape
    w, h = patch_size
    Wp, Hp = W // w, H // h
    M = Wp * Hp
    K = C * w * h
    E = w_conv.shape[0]
    n = ids_keep.shape[1]
    m = ids_keep_p.shape[2]

    # --- outer mask: gather ONLY the kept slices (no full-volume copy) -------
    kept = jax.vmap(lambda im, idx: im[:, idx])(img, ids_keep)   # (B, C, n, W, H)

    # --- patchify the kept slices with the reference strided layout ----------
    patches = kept.reshape(B, C, n, w, Wp, h, Hp)
    patches = patches.transpose(0, 2, 4, 6, 1, 3, 5).reshape(B, n, M, K)
    patches = patches.astype(jnp.bfloat16)                       # MXU-native

    # --- conv weight pre-transposed to (K, E) so the kernel does x @ W -------
    wk = jnp.transpose(w_conv.reshape(E, K)).astype(jnp.bfloat16)

    # --- pad K to a lane multiple (zero rows/cols => exact result) -----------
    Kp = ((K + 127) // 128) * 128
    if Kp != K:
        patches = jnp.pad(patches, ((0, 0), (0, 0), (0, 0), (0, Kp - K)))
        wk = jnp.pad(wk, ((0, Kp - K), (0, 0)))

    # --- group G kept slices per grid step (VMEM-budget aware) ---------------
    G = _choose_group_size(n, m, M, Kp, E)
    nG = n // G
    patches = patches.reshape(B, nG, G, M, Kp)
    ids_col = ids_keep_p.astype(jnp.int32).reshape(B, nG, G * m, 1)
    bias = b_conv.reshape(1, E).astype(jnp.float32)
    pos = inner_pos.reshape(M, E).astype(jnp.bfloat16)

    need = _per_step_vmem_bytes(G, m, M, Kp, E)
    vmem_limit = int(min(60 << 20, max(32 << 20, 3 * need // 2)))

    grid_spec = pltpu.PrefetchScalarGridSpec(
        num_scalar_prefetch=0,
        grid=(B, nG),
        in_specs=[
            pl.BlockSpec((1, 1, G, M, Kp), lambda b, i: (b, i, 0, 0, 0)),
            pl.BlockSpec((1, 1, G * m, 1), lambda b, i: (b, i, 0, 0)),
            # constant-index parameters: DMA'd once, reused across the grid
            pl.BlockSpec((Kp, E), lambda b, i: (0, 0)),
            pl.BlockSpec((1, E), lambda b, i: (0, 0)),
            pl.BlockSpec((M, E), lambda b, i: (0, 0)),
        ],
        out_specs=pl.BlockSpec((1, 1, G * m, E), lambda b, i: (b, i, 0, 0)),
        scratch_shapes=[pltpu.VMEM((G * m, Kp), jnp.bfloat16)],
    )
    out = pl.pallas_call(
        _patch_embed_kernel,
        out_shape=jax.ShapeDtypeStruct((B, nG, G * m, E), img.dtype),
        grid_spec=grid_spec,
        compiler_params=pltpu.CompilerParams(
            dimension_semantics=("parallel", "parallel"),
            vmem_limit_bytes=vmem_limit),
    )(patches, ids_col, wk, bias, pos)
    return out.reshape(B, n, m, E)


def slice_encoder_forward(img, key, w_conv, b_conv, inner_pos, *, patch_size,
                          inner_mask_ratio=0.5, outer_mask_ratio=0.5):
    """Full SliceEncoder.forward: random masking in the JAX wrapper, inner-mask
    gather + pos gather + patch embedding in the Pallas kernel. Returns
    (x, ids_keep, ids_drop, ids_restore) like the PyTorch module."""
    B, C, N, W, H = img.shape
    w, h = patch_size
    M = (W // w) * (H // h)
    n = int(N * (1 - outer_mask_ratio))
    m = int(M * (1 - inner_mask_ratio))
    ids_keep, ids_drop, ids_restore, ids_keep_p = _make_mask_ids(key, B, N, n, M, m)
    x = patch_embed_pallas(img, ids_keep, ids_keep_p, w_conv, b_conv, inner_pos,
                           patch_size=patch_size)
    return x, ids_keep, ids_drop, ids_restore


# ----------------------------------------------------------------------------
# Pure-JAX reference mirroring the PyTorch forward (given the same mask ids).
# ----------------------------------------------------------------------------
def slice_encoder_reference(img, ids_keep, ids_keep_p, w_conv, b_conv, inner_pos,
                            *, patch_size):
    B, C, N, W, H = img.shape
    w, h = patch_size
    Wp, Hp = W // w, H // h
    M = Wp * Hp
    E = w_conv.shape[0]
    n = ids_keep.shape[1]
    m = ids_keep_p.shape[2]

    sl = jax.vmap(lambda im, idx: im[:, idx])(img, ids_keep)        # (B, C, n, W, H)
    sl = sl.reshape(B, C, n, w, Wp, h, Hp).transpose(0, 2, 4, 6, 1, 3, 5)
    sl = sl.reshape(B, n, M, C, w, h)
    pm = jax.vmap(jax.vmap(lambda s, idx: s[idx]))(sl, ids_keep_p)  # (B, n, m, C, w, h)
    flat = pm.reshape(B * n * m, C * w * h)
    x = flat @ w_conv.reshape(E, -1).T + b_conv                     # conv == linear
    x = x.reshape(B, n, m, E)
    pos = inner_pos.reshape(M, E)[ids_keep_p]                       # (B, n, m, E)
    return x + pos


if __name__ == "__main__":
    # Small shapes consistent with the module:
    # B=2, in_channels=3, num_slices=8, slice 16x16, patch 8x8 -> M=4,
    # embed_dims=128 (multiple of 128 for lane-dense output),
    # inner/outer mask ratio 0.5 -> n=4 kept slices, m=2 kept patches.
    B, Cin, N, W, H = 2, 3, 8, 16, 16
    w = h = 8
    E = 128
    inner_mask_ratio = outer_mask_ratio = 0.5
    M = (W // w) * (H // h)
    n = int(N * (1 - outer_mask_ratio))
    m = int(M * (1 - inner_mask_ratio))

    key = jax.random.PRNGKey(0)
    k_img, k_w, k_b, k_pos, k_mask = jax.random.split(key, 5)
    img = jax.random.normal(k_img, (B, Cin, N, W, H), dtype=jnp.float32)
    w_conv = 0.05 * jax.random.normal(k_w, (E, Cin, w, h), dtype=jnp.float32)
    b_conv = 0.01 * jax.random.normal(k_b, (E,), dtype=jnp.float32)
    inner_pos = 0.02 * jax.random.normal(k_pos, (1, M, E), dtype=jnp.float32)

    # Make every float input exactly bf16-representable so the bf16 MXU path
    # and the pure-JAX f32 reference agree to accumulation-order precision.
    rep = lambda a: a.astype(jnp.bfloat16).astype(jnp.float32)
    img, w_conv, b_conv, inner_pos = map(rep, (img, w_conv, b_conv, inner_pos))

    x, ids_keep, ids_drop, ids_restore = slice_encoder_forward(
        img, k_mask, w_conv, b_conv, inner_pos, patch_size=(w, h),
        inner_mask_ratio=inner_mask_ratio, outer_mask_ratio=outer_mask_ratio)
    x = jax.block_until_ready(x)

    # Reference uses the SAME mask ids (re-derived from the same key).
    ids_keep_r, ids_drop_r, ids_restore_r, ids_keep_p = _make_mask_ids(
        k_mask, B, N, n, M, m)
    ref = slice_encoder_reference(img, ids_keep_r, ids_keep_p, w_conv, b_conv,
                                  inner_pos, patch_size=(w, h))

    assert x.shape == (B, n, m, E)
    assert ids_keep.shape == (B, n) and ids_drop.shape == (B, N - n)
    assert ids_restore.shape == (B, N)
    assert jnp.array_equal(ids_keep, ids_keep_r)
    assert jnp.allclose(x, ref, atol=1e-4, rtol=1e-4), \
        f"mismatch vs reference: max abs err {float(jnp.max(jnp.abs(x - ref)))}"

    print("KERNEL_OK")
</pallas_src>

<mosaic_0001>
module attributes {stable_mosaic.version = 11 : i64} {
  func.func @_patch_embed_kernel(%arg0: i32, %arg1: i32, %arg2: memref<1x1x4x4x256xbf16, #tpu.memory_space<vmem>>, %arg3: memref<1x1x8x1xi32, #tpu.memory_space<vmem>>, %arg4: memref<256x128xbf16, #tpu.memory_space<vmem>>, %arg5: memref<1x128xf32, #tpu.memory_space<vmem>>, %arg6: memref<4x128xbf16, #tpu.memory_space<vmem>>, %arg7: memref<1x1x8x128xf32, #tpu.memory_space<vmem>>, %arg8: memref<8x256xbf16, #tpu.memory_space<vmem>>) attributes {dimension_semantics = [#tpu.dimension_semantics<parallel>, #tpu.dimension_semantics<parallel>], iteration_bounds = array<i64: 2, 1>, scalar_prefetch = 0 : i64, scratch_operands = 1 : i64, tpu.core_type = #tpu.core_type<tc>, window_params = [{transform_indices = @transform_0, window_bounds = array<i64: 1, 1, 4, 4, 256>}, {transform_indices = @transform_1, window_bounds = array<i64: 1, 1, 8, 1>}, {pipeline_mode = #tpu.pipeline_mode<synchronous>, transform_indices = @transform_2, window_bounds = array<i64: 256, 128>}, {pipeline_mode = #tpu.pipeline_mode<synchronous>, transform_indices = @transform_3, window_bounds = array<i64: 1, 128>}, {pipeline_mode = #tpu.pipeline_mode<synchronous>, transform_indices = @transform_4, window_bounds = array<i64: 4, 128>}, {transform_indices = @transform_5, window_bounds = array<i64: 1, 1, 8, 128>}]} {
    %c0 = arith.constant 0 : index
    %c0_0 = arith.constant 0 : index
    %c0_1 = arith.constant 0 : index
    %c0_2 = arith.constant 0 : index
    %0 = vector.load %arg3[%c0, %c0_0, %c0_1, %c0_2] : memref<1x1x8x1xi32, #tpu.memory_space<vmem>>, vector<1x1x8x1xi32>
    %1 = vector.shape_cast %0 : vector<1x1x8x1xi32> to vector<8x1xi32>
    %2 = tpu.iota {dimensions = array<i32: 1>} : vector<8x4xi32>
    %3 = vector.broadcast %1 : vector<8x1xi32> to vector<8x4xi32>
    %4 = arith.cmpi eq, %2, %3 : vector<8x4xi32>
    %5 = arith.extui %4 : vector<8x4xi1> to vector<8x4xi32>
    %6 = arith.sitofp %5 : vector<8x4xi32> to vector<8x4xf32>
    %7 = arith.truncf %6 : vector<8x4xf32> to vector<8x4xbf16>
    %c0_3 = arith.constant 0 : index
    %c0_4 = arith.constant 0 : index
    %8 = vector.load %arg6[%c0_3, %c0_4] : memref<4x128xbf16, #tpu.memory_space<vmem>>, vector<4x128xbf16>
    %cst = arith.constant dense<0.000000e+00> : vector<8x128xf32>
    %9 = tpu.matmul %7, %8, %cst {dimension_numbers = #tpu.dot_dimension_numbers<[1], [0], [0], [1], [0, 0, 1, 1], [], []>} : vector<8x4xbf16>, vector<4x128xbf16>, vector<8x128xf32> -> vector<8x128xf32>
    %10 = vector.extract_strided_slice %7 {offsets = [0, 0], sizes = [2, 4], strides = [1, 1]} : vector<8x4xbf16> to vector<2x4xbf16>
    %c0_5 = arith.constant 0 : index
    %c0_6 = arith.constant 0 : index
    %c0_7 = arith.constant 0 : index
    %c0_8 = arith.constant 0 : index
    %c0_9 = arith.constant 0 : index
    %11 = vector.load %arg2[%c0_5, %c0_6, %c0_7, %c0_8, %c0_9] : memref<1x1x4x4x256xbf16, #tpu.memory_space<vmem>>, vector<1x1x1x4x256xbf16>
    %12 = vector.shape_cast %11 : vector<1x1x1x4x256xbf16> to vector<4x256xbf16>
    %cst_10 = arith.constant dense<0.000000e+00> : vector<2x256xf32>
    %13 = tpu.matmul %10, %12, %cst_10 {dimension_numbers = #tpu.dot_dimension_numbers<[1], [0], [0], [1], [0, 0, 1, 1], [], []>} : vector<2x4xbf16>, vector<4x256xbf16>, vector<2x256xf32> -> vector<2x256xf32>
    %14 = arith.truncf %13 : vector<2x256xf32> to vector<2x256xbf16>
    %c0_11 = arith.constant 0 : index
    %c0_12 = arith.constant 0 : index
    %15 = vector.load %arg8[%c0_11, %c0_12] : memref<8x256xbf16, #tpu.memory_space<vmem>>, vector<2x256xbf16>
    tpu.vector_store %arg8[%c0_11, %c0_12], %14 {strides = array<i32>} : memref<8x256xbf16, #tpu.memory_space<vmem>>, vector<2x256xbf16>,
    %16 = vector.extract_strided_slice %7 {offsets = [2, 0], sizes = [2, 4], strides = [1, 1]} : vector<8x4xbf16> to vector<2x4xbf16>
    %c0_13 = arith.constant 0 : index
    %c0_14 = arith.constant 0 : index
    %c1 = arith.constant 1 : index
    %c0_15 = arith.constant 0 : index
    %c0_16 = arith.constant 0 : index
    %17 = vector.load %arg2[%c0_13, %c0_14, %c1, %c0_15, %c0_16] : memref<1x1x4x4x256xbf16, #tpu.memory_space<vmem>>, vector<1x1x1x4x256xbf16>
    %18 = vector.shape_cast %17 : vector<1x1x1x4x256xbf16> to vector<4x256xbf16>
    %cst_17 = arith.constant dense<0.000000e+00> : vector<2x256xf32>
    %19 = tpu.matmul %16, %18, %cst_17 {dimension_numbers = #tpu.dot_dimension_numbers<[1], [0], [0], [1], [0, 0, 1, 1], [], []>} : vector<2x4xbf16>, vector<4x256xbf16>, vector<2x256xf32> -> vector<2x256xf32>
    %20 = arith.truncf %19 : vector<2x256xf32> to vector<2x256xbf16>
    %c2 = arith.constant 2 : index
    %c0_18 = arith.constant 0 : index
    %21 = vector.load %arg8[%c2, %c0_18] : memref<8x256xbf16, #tpu.memory_space<vmem>>, vector<2x256xbf16>
    tpu.vector_store %arg8[%c2, %c0_18], %20 {strides = array<i32>} : memref<8x256xbf16, #tpu.memory_space<vmem>>, vector<2x256xbf16>,
    %22 = vector.extract_strided_slice %7 {offsets = [4, 0], sizes = [2, 4], strides = [1, 1]} : vector<8x4xbf16> to vector<2x4xbf16>
    %c0_19 = arith.constant 0 : index
    %c0_20 = arith.constant 0 : index
    %c2_21 = arith.constant 2 : index
    %c0_22 = arith.constant 0 : index
    %c0_23 = arith.constant 0 : index
    %23 = vector.load %arg2[%c0_19, %c0_20, %c2_21, %c0_22, %c0_23] : memref<1x1x4x4x256xbf16, #tpu.memory_space<vmem>>, vector<1x1x1x4x256xbf16>
    %24 = vector.shape_cast %23 : vector<1x1x1x4x256xbf16> to vector<4x256xbf16>
    %cst_24 = arith.constant dense<0.000000e+00> : vector<2x256xf32>
    %25 = tpu.matmul %22, %24, %cst_24 {dimension_numbers = #tpu.dot_dimension_numbers<[1], [0], [0], [1], [0, 0, 1, 1], [], []>} : vector<2x4xbf16>, vector<4x256xbf16>, vector<2x256xf32> -> vector<2x256xf32>
    %26 = arith.truncf %25 : vector<2x256xf32> to vector<2x256xbf16>
    %c4 = arith.constant 4 : index
    %c0_25 = arith.constant 0 : index
    %27 = vector.load %arg8[%c4, %c0_25] : memref<8x256xbf16, #tpu.memory_space<vmem>>, vector<2x256xbf16>
    tpu.vector_store %arg8[%c4, %c0_25], %26 {strides = array<i32>} : memref<8x256xbf16, #tpu.memory_space<vmem>>, vector<2x256xbf16>,
    %28 = vector.extract_strided_slice %7 {offsets = [6, 0], sizes = [2, 4], strides = [1, 1]} : vector<8x4xbf16> to vector<2x4xbf16>
    %c0_26 = arith.constant 0 : index
    %c0_27 = arith.constant 0 : index
    %c3 = arith.constant 3 : index
    %c0_28 = arith.constant 0 : index
    %c0_29 = arith.constant 0 : index
    %29 = vector.load %arg2[%c0_26, %c0_27, %c3, %c0_28, %c0_29] : memref<1x1x4x4x256xbf16, #tpu.memory_space<vmem>>, vector<1x1x1x4x256xbf16>
    %30 = vector.shape_cast %29 : vector<1x1x1x4x256xbf16> to vector<4x256xbf16>
    %cst_30 = arith.constant dense<0.000000e+00> : vector<2x256xf32>
    %31 = tpu.matmul %28, %30, %cst_30 {dimension_numbers = #tpu.dot_dimension_numbers<[1], [0], [0], [1], [0, 0, 1, 1], [], []>} : vector<2x4xbf16>, vector<4x256xbf16>, vector<2x256xf32> -> vector<2x256xf32>
    %32 = arith.truncf %31 : vector<2x256xf32> to vector<2x256xbf16>
    %c6 = arith.constant 6 : index
    %c0_31 = arith.constant 0 : index
    %33 = vector.load %arg8[%c6, %c0_31] : memref<8x256xbf16, #tpu.memory_space<vmem>>, vector<2x256xbf16>
    tpu.vector_store %arg8[%c6, %c0_31], %32 {strides = array<i32>} : memref<8x256xbf16, #tpu.memory_space<vmem>>, vector<2x256xbf16>,
    %c0_32 = arith.constant 0 : index
    %c0_33 = arith.constant 0 : index
    %34 = vector.load %arg8[%c0_32, %c0_33] : memref<8x256xbf16, #tpu.memory_space<vmem>>, vector<8x256xbf16>
    %c0_34 = arith.constant 0 : index
    %c0_35 = arith.constant 0 : index
    %35 = vector.load %arg4[%c0_34, %c0_35] : memref<256x128xbf16, #tpu.memory_space<vmem>>, vector<256x128xbf16>
    %cst_36 = arith.constant dense<0.000000e+00> : vector<8x128xf32>
    %36 = tpu.matmul %34, %35, %cst_36 {dimension_numbers = #tpu.dot_dimension_numbers<[1], [0], [0], [1], [0, 0, 1, 1], [], []>} : vector<8x256xbf16>, vector<256x128xbf16>, vector<8x128xf32> -> vector<8x128xf32>
    %c0_37 = arith.constant 0 : index
    %c0_38 = arith.constant 0 : index
    %37 = vector.load %arg5[%c0_37, %c0_38] : memref<1x128xf32, #tpu.memory_space<vmem>>, vector<1x128xf32>
    %38 = vector.broadcast %37 : vector<1x128xf32> to vector<8x128xf32>
    %39 = arith.addf %36, %38 : vector<8x128xf32>
    %40 = arith.addf %39, %9 : vector<8x128xf32>
    %c0_39 = arith.constant 0 : index
    %c0_40 = arith.constant 0 : index
    %c0_41 = arith.constant 0 : index
    %c0_42 = arith.constant 0 : index
    %41 = vector.load %arg7[%c0_39, %c0_40, %c0_41, %c0_42] : memref<1x1x8x128xf32, #tpu.memory_space<vmem>>, vector<1x1x8x128xf32>
    %42 = vector.shape_cast %41 : vector<1x1x8x128xf32> to vector<8x128xf32>
    %43 = vector.shape_cast %40 : vector<8x128xf32> to vector<1x1x8x128xf32>
    tpu.vector_store %arg7[%c0_39, %c0_40, %c0_41, %c0_42], %43 {strides = array<i32>} : memref<1x1x8x128xf32, #tpu.memory_space<vmem>>, vector<1x1x8x128xf32>,
    return
  }
  func.func @transform_0(%arg0: i32, %arg1: i32) -> (i32, i32, i32, i32, i32) {
    %c0_i32 = arith.constant 0 : i32
    %c0_i32_0 = arith.constant 0 : i32
    %c0_i32_1 = arith.constant 0 : i32
    %c0_i32_2 = arith.constant 0 : i32
    return %arg0, %arg1, %c0_i32, %c0_i32_0, %c0_i32_1 : i32, i32, i32, i32, i32
  }
  func.func @transform_1(%arg0: i32, %arg1: i32) -> (i32, i32, i32, i32) {
    %c0_i32 = arith.constant 0 : i32
    %c0_i32_0 = arith.constant 0 : i32
    %c0_i32_1 = arith.constant 0 : i32
    return %arg0, %arg1, %c0_i32, %c0_i32_0 : i32, i32, i32, i32
  }
  func.func @transform_2(%arg0: i32, %arg1: i32) -> (i32, i32) {
    %c0_i32 = arith.constant 0 : i32
    %c0_i32_0 = arith.constant 0 : i32
    %c0_i32_1 = arith.constant 0 : i32
    return %c0_i32, %c0_i32_0 : i32, i32
  }
  func.func @transform_3(%arg0: i32, %arg1: i32) -> (i32, i32) {
    %c0_i32 = arith.constant 0 : i32
    %c0_i32_0 = arith.constant 0 : i32
    %c0_i32_1 = arith.constant 0 : i32
    return %c0_i32, %c0_i32_0 : i32, i32
  }
  func.func @transform_4(%arg0: i32, %arg1: i32) -> (i32, i32) {
    %c0_i32 = arith.constant 0 : i32
    %c0_i32_0 = arith.constant 0 : i32
    %c0_i32_1 = arith.constant 0 : i32
    return %c0_i32, %c0_i32_0 : i32, i32
  }
  func.func @transform_5(%arg0: i32, %arg1: i32) -> (i32, i32, i32, i32) {
    %c0_i32 = arith.constant 0 : i32
    %c0_i32_0 = arith.constant 0 : i32
    %c0_i32_1 = arith.constant 0 : i32
    return %arg0, %arg1, %c0_i32, %c0_i32_0 : i32, i32, i32, i32
  }
}

</mosaic_0001>

<bundles_post_ra>
// kernel: tpu_custom_call.1
= control target key start
LH: loop header
LB: loop body
LE: loop exit
PB: predicated region body
PF: predicated region fallthrough
CT: control target
= control target key end

     0   :  { %s1526_s0 = inlined_call_operand.hbm [shape: bf16[2,1,4,4,256], index: 0, kind: input, shape index: {}]   ;;  %s1527_s1 = inlined_call_operand.vmem [shape: s32[2,1,8,1], index: 1, kind: input, shape index: {}]   ;;  %s1528_s2 = inlined_call_operand.hbm [shape: bf16[256,128], index: 2, kind: input, shape index: {}]   ;;  %s1529_s3 = inlined_call_operand.vmem [shape: f32[1,128], index: 3, kind: input, shape index: {}]   ;;  %s1530_s4 = inlined_call_operand.vmem [shape: bf16[4,128], index: 4, kind: input, shape index: {}]   ;;  %s1531_s5 = inlined_call_operand.hbm [shape: f32[2,1,8,128], index: 5, kind: output, shape index: {}]  }
   0x1   :  { %1536 = sst [smem:[#allocation13_spill]] %s1528_s2 }
   0x2   :  { %10 = vsyncpa [#allocation4], 0 }
   0x3   :  { %12 = vsyncpa [#allocation4 + $0x1], 0 }
   0x4   :  { %13 = vsyncpa [#allocation7], 0 }
   0x5   :  { %14 = vsyncpa [#allocation5], 0 }
   0x6   :  { %16 = vsyncpa [#allocation5 + $0x1], 0  ;;  %s1321_s18 = smov 0   ;;  %s1323_s19 = smov 0  }
   0x7   :  { %s1325_s20 = smov 0   ;;  %s1327_s21 = smov 0  }
   0x8   :  { %s1329_s22 = smov 0   ;;  %s1331_s23 = smov 0  }
   0x9 LB: > { %s954_s24 = sadd.s32 4294967295, %s1281_s23   ;;  %s955_s25 = sadd.s32 4294967294, %s1281_s23   ;;  %s1281_s23 = sphi %s1331_s23, %s22_s23   ;;  %s1277_s22 = sphi %s1329_s22, %s1558_s22   ;;  %s1273_s21 = sphi %s1327_s21, %s1557_s21   ;;  %s1269_s20 = sphi %s1325_s20, %s1556_s20   ;;  %s1265_s19 = sphi %s1323_s19, %s1555_s19   ;;  %s1261_s18 = sphi %s1321_s18, %s1554_s18  }
   0xa   : > { %p56_p0 = scmp.ne.s32.totalorder %s1265_s19, %s1261_s18  ;;  %p1355_p1 = scmp.eq.s32.totalorder %s954_s24, 0 }
   0xb   : > { %p1359_p2 = scmp.eq.s32.totalorder %s954_s24, 1  ;;  %p179_p3 = scmp.eq.s32.totalorder %s955_s25, 1 }
   0xc   : > { %p1365_p4 = por %p1355_p1, %p56_p0  ;;  %p956_p5 = scmp.ge.s32.totalorder %s1281_s23, 1 }
   0xd   : > { %p1370_p6 = por %p179_p3, %p56_p0  ;;  %p186_p7 = scmp.lt.s32.totalorder %s1281_s23, 3 }
   0xe   : > { %s1539_s28 = scalar_select %p1365_p4, 1, 0 }
   0xf   : > { %s1540_s29 = scalar_select %p1370_p6, 1, 0 }
  0x10   : > { %p1375_p8 = pnand %p956_p5, %p186_p7  ;;  %s1283_s6 = smov [#allocation6]  }
  0x11   : > { %s198_s7 = sshll.u32 %s1283_s6, 4  ;;  %s34_s9 = sadd.s32 1, %s1277_s22  ;;  %s199_s7 = int_to_ptr.vmem [resolvable:$true] %s198_s7 }
  0x12   : > { %p1054_p9 = pneg %p1375_p8  ;;  %s1154_s10 = scalar_lea.vmem %s199_s7, 2048 }
  0x13   : > { %p1155_p13 = scmp.ne.s32.totalorder %s199_s7, %s1154_s10  ;;  %p1162_p5 = scmp.lt.s32.totalorder %s199_s7, %s199_s7 }
  0x14   : > { %p1384_p11 = pnand %p1054_p9, %p1355_p1  ;;  %p1163_p7 = scmp.lt.s32.totalorder %s1154_s10, %s1154_s10 }
  0x16   : > { %p1145_p12 = pneg %p1384_p11  ;;  %p1164_p6 = por %p1163_p7, %p1162_p5 }
  0x18   : > { %p1157_p0 = pnand %p1155_p13, %p1145_p12 }
  0x1a   : > { %p1158_p3 = pneg %p1157_p0 }
  0x1c   : > { %p1165_p4 = pnand %p1164_p6, %p1158_p3 }
  0x1e   : > { %1168 = shalt.err (!%p1165_p4)
}
  0x1f   : > { %s1533_s11 = smov 64   ;;  %s1534_s12 = smov 4  }
  0x20   : > { %s1543_s2 = sld [smem:[#allocation13_spill]]  ;;  %p36_p4 = scmp.ge.s32.totalorder %s34_s9, 2 }
  0x21   : > { %s43_s15 = sadd.s32 1, %s1269_s20  ;;  %p50_p6 = scmp.ne.s32.totalorder %s1269_s20, %s1265_s19 }
  0x22   : > { %p51_p9 = scmp.eq.s32.totalorder %s1281_s23, 0  ;;  %s1560_s9 = smov (%p36_p4, %s34_s9), 0 }
  0x23   : > { %1544 = sst [smem:[#allocation12_spill]] %s1560_s9  ;;  %p1411_p13 = por %p1359_p2, %p50_p6 }
  0x24   : > { %p1405_p12 = por %p51_p9, %p50_p6  ;;  %s38_s24 = ssub.s32 %s1277_s22, %s1560_s9 }
  0x25   : > { %p1067_p0 = scmp.lt.s32.totalorder %s1281_s23, 2  ;;  %s218_s25 = sand.u32 1, %s1269_s20  }
  0x26   : > { %1057 = dma.hbm_to_vmem [thread:$0]  (!%p1384_p11), %s1543_s2, 2048, %s199_s7, [#allocation7], %s1533_s11, %s1533_s11, %s1534_s12  }
  0x27   : > { %p41_p11 = scmp.eq.s32.totalorder %s38_s24, 0  ;;  %s959_s6 = sshll.u32 %s218_s25, 4 }
  0x28   : > { %s1011_s8 = sshll.u32 %s1277_s22, 8  ;;  %s222_s11 = scalar_lea.vmem [#allocation3], %s959_s6 }
  0x29   : > { %s1420_s7 = scalar_select %p41_p11, %s1269_s20, %s43_s15  }
  0x2a   : > { %s230_s14 = scalar_lea.hbm %s1526_s0, %s1011_s8  ;;  %s231_s12 = sshll.u32 %s222_s11, 4  ;;  %s232_s12 = int_to_ptr.vmem [resolvable:$true] %s231_s12 }
  0x2b   : > { %p1428_p2 = pnand %p1067_p0, %p1405_p12  ;;  %s219_s2 = scalar_lea.sflag [#allocation4], %s218_s25 }
  0x2c   : > { %s1182_s24 = scalar_lea.vmem %s232_s12, 256  ;;  %s1286_s15 = smov [#allocation3]  }
  0x2d   : > { %p1171_p3 = pneg %p1428_p2  ;;  %p1183_p5 = scmp.ne.s32.totalorder %s232_s12, %s1182_s24 }
  0x2e   : > { %s1187_s9 = sshll.u32 %s1286_s15, 4  ;;  %s1188_s9 = int_to_ptr.vmem [resolvable:$false] %s1187_s9 }
  0x2f   : > { %p1185_p7 = pnand %p1183_p5, %p1171_p3  ;;  %s1189_s8 = scalar_lea.vmem %s1188_s9, 512 }
  0x30   : > { %p1190_p6 = scmp.lt.s32.totalorder %s232_s12, %s1188_s9  ;;  %p1191_p9 = scmp.lt.s32.totalorder %s1189_s8, %s1182_s24 }
  0x31   : > { %p1186_p4 = pneg %p1185_p7 }
  0x32   : > { %p1192_p11 = por %p1191_p9, %p1190_p6 }
  0x34   : > { %p1193_p10 = pnand %p1192_p11, %p1186_p4 }
  0x36   : > { %1196 = shalt.err (!%p1193_p10)
}
  0x37   : > { %s1548_s11 = smov 4   ;;  %s1549_s16 = smov 64  }
  0x38   : > { %1061 = dma.hbm_to_vmem [thread:$0]  (!%p1428_p2), %s230_s14, 256, %s232_s12, %s219_s2, %s1549_s16, %s1549_s16, %s1548_s11  }
  0x39   : > { %253 = sbr.rel (%p1375_p8) target bundleno = 648 (0x288), region = 40  ;;  %s1442_s25 = sand.u32 (!%p1375_p8), 1, %s1265_s19  }
  0x3a   : > { %s963_s9 = sshll.u32 (!%p1375_p8), %s1442_s25, 4  ;;  %s256_s6 = scalar_lea.sflag (!%p1375_p8), [#allocation4], %s1442_s25 }
  0x3b   : > { %s1446_s10 = scalar_lea.vmem (!%p1375_p8), [#allocation3], %s963_s9  ;;  %p1550_p10 = scmp.ne.s32.totalorder (!%p1375_p8), %s1539_s28, 0 }
  0x3e   : > { %1248 = dma.done.wait (%p1550_p10), %s256_s6, 256  }
  0x3f   : > { %1250 = vsyncadd (%p1550_p10), %s256_s6, 4294967040 }
  0x40   : > { %1252 = dma.done.wait (%p1355_p1), [#allocation7], 2048  }
  0x41   : > { %1254 = vsyncadd (%p1355_p1), [#allocation7], 4294965248  ;;  %p297_p8 = scmp.lt.s32.totalorder %s1273_s21, 1  ;;  %v1287_v0 = vmov 0   ;;  %v1288_v1 = vmov 0.0   ;;  %vm320_vm0 = vcmask 1041408   ;;  %v306_v10 = vlaneseq }
  0x42   : > { %1124 = vset.pattern.permute.xlu0 %v1287_v0  ;;  %1040 = vmatprep.subr.bf16.mxu0 %v1288_v1  ;;  %v315_v3 = vld [vmem:[%s1530_s4] sm:$0x3]  ;;  %vm1289_vm1 = vmmov 0   ;;  %vm316_vm3 = vcmask 31744   ;;  %v1127_v27 = vld [vmem:[#allocation6 + $0x70] sm:$0xff]   ;;  %v1129_v29 = vld [vmem:[#allocation6 + $0x68] sm:$0xff]  }
  0x43   : > { %s298_s2 = scalar_select %p297_p8, %s1273_s21, 1  ;;  %556 = vmatprep.mubr.bf16.mxu1 %v1287_v0  ;;  %1042 = vmatprep.mubr.msk.bf16.mxu0 %vm1289_vm1, %v1288_v1  ;;  %v322_v4 = vsel %vm320_vm0, %v315_v3, 0  ;;  %v979_v5 = vld.sshfl [vmem:[%s1446_s10 + $0x8] sm:$0x33 pattern:$0x76325410] }
  0x44   : > { %1041 = vmatpush3.bf16.msra.mxu0 %v322_v4  ;;  %v514_v6 = vcombine.high %v979_v5, %v979_v5  ;;  %v969_v7 = vld.sshfl [vmem:[%s1446_s10] sm:$0x33 pattern:$0x76325410]  ;;  %v519_v8 = vsel %vm320_vm0, %v979_v5, 0  ;;  %v307_v11 = vand.u32 127, %v306_v10 }
  0x45   : > { %s966_s30 = sshll.u32 %s298_s2, 3  ;;  %v373_v9 = vcombine.high %v969_v7, %v969_v7  ;;  %v974_v13 = vld.sshfl [vmem:[%s1446_s10 + $0x4] sm:$0x33 pattern:$0x76325410]  ;;  %v375_v16 = vsel %vm320_vm0, %v969_v7, 0 }
  0x46   : > { %s303_s13 = scalar_lea.vmem %s1527_s1, %s966_s30  ;;  %980 = vmatprep.subr.msk.bf16.mxu1 %vm320_vm0, %v514_v6  ;;  %v442_v17 = vcombine.high %v974_v13, %v974_v13  ;;  %v984_v19 = vld.sshfl [vmem:[%s1446_s10 + $0xc] sm:$0x33 pattern:$0x76325410]  ;;  %v447_v20 = vsel %vm320_vm0, %v974_v13, 0  ;;  %v1128_v28 = vld [vmem:[#allocation6 + $0x30] sm:$0xff]  }
  0x47   : > { %v305_v2 = vld [vmem:[%s303_s13] sm:$0xff]  ;;  %970 = vmatprep.subr.msk.bf16.mxu0 %vm320_vm0, %v373_v9  ;;  %539 = vmatpush1.bf16.msra.mxu1 %v519_v8  ;;  %v586_v21 = vcombine.high %v984_v19, %v984_v19  ;;  %v591_v23 = vsel %vm320_vm0, %v984_v19, 0  ;;  %v1130_v30 = vld [vmem:[#allocation6 + $0x28] sm:$0xff]   ;;  %v1131_v31 = vld [vmem:[#allocation6 + $0x60] sm:$0xff]   ;;  %s965_s27 = sshll.u32 %s1442_s25, 3  ;;  %s1008_s8 = sshll.u32 %s1273_s21, 7 }
  0x48   : > { %309 = vperm.xlu0 %1124, %v305_v2   ;;  %v1125_v25 = vld [vmem:[#allocation6 + $0x78] sm:$0xff]   ;;  %v1132_v32 = vld [vmem:[#allocation6 + $0x20] sm:$0xff]   ;;  %v1135_v35 = vld [vmem:[#allocation6 + $0x50] sm:$0xff]   ;;  %s296_s11 = scalar_lea.vmem [#allocation8], %s965_s27  ;;  %s845_s10 = scalar_lea.hbm %s1531_s5, %s1008_s8 }
  0x49   : > { %v1126_v26 = vld [vmem:[#allocation6 + $0x38] sm:$0xff]   ;;  %1018 = vmatprep.subr.bf16.mxu1 %v1125_v25  ;;  %v1136_v36 = vld [vmem:[#allocation6 + $0x10] sm:$0xff]   ;;  %v1137_v37 = vld [vmem:[#allocation6 + $0x48] sm:$0xff]   ;;  %s847_s16 = sshll.u32 %s296_s11, 4  ;;  %s833_s2 = scalar_lea.sflag [#allocation5], %s1442_s25  ;;  %s848_s16 = int_to_ptr.vmem [resolvable:$true] %s847_s16 }
  0x4a   : > { %v1133_v33 = vld [vmem:[#allocation6 + $0x58] sm:$0xff]   ;;  %v1138_v38 = vld [vmem:[#allocation6 + $0x8] sm:$0xff]   ;;  %v1139_v39 = vld [vmem:[#allocation6 + $0x40] sm:$0xff]   ;;  %s1197_s30 = scalar_lea.vmem %s848_s16, 128  ;;  %s1290_s28 = smov [#allocation8]  }
  0x4b   : > { %v1134_v34 = vld [vmem:[#allocation6 + $0x18] sm:$0xff]   ;;  %v1140_v40 = vld [vmem:[#allocation6] sm:$0xff]   ;;  %p1198_p1 = scmp.ne.s32.totalorder %s848_s16, %s1197_s30  ;;  %s1201_s12 = sshll.u32 %s1290_s28, 4  ;;  %s1202_s12 = int_to_ptr.vmem [resolvable:$false] %s1201_s12 }
  0x4c   : > { %v988_v8 = vld [vmem:[%s1529_s3] ss:$0 sm:$0xff]  ;;  %s1203_s21 = scalar_lea.vmem %s1202_s12, 256  ;;  %p1204_p2 = scmp.lt.s32.totalorder %s848_s16, %s1202_s12 }
  0x4d   : > { %p1199_p12 = pnand %p1198_p1, %p1411_p13  ;;  %p1205_p3 = scmp.lt.s32.totalorder %s1203_s21, %s1197_s30 }
  0x4f   : > { %p1200_p0 = pneg %p1199_p12  ;;  %p1206_p5 = por %p1205_p3, %p1204_p2 }
  0x51   : > { %p1207_p7 = pnand %p1206_p5, %p1200_p0 }
  0xc3   : > { %v310_v12 = vpop.permute.xlu0 %309 }
  0xc4   : > { %vm311_vm2 = vcmp.eq.s32.totalorder %v307_v11, %v310_v12 }
  0xc5   : > { %v967_v14 = vsel %vm311_vm2, 1.0, %v1288_v1 }
  0xc6   : > { %v314_v15 = vpack.c.bf16 %v967_v14, %v967_v14 }
  0xc8   : > { %1043 = vmatmul.mubr.msk.bf16.vlgmr.msra.gmra.mxu0 %vm316_vm3, %v314_v15  ;;  %v505_v18 = vrot.slane %v314_v15, 2  ;;  %v433_v22 = vrot.slane %v314_v15, 1  ;;  %v577_v24 = vrot.slane %v314_v15, 3 }
  0xc9   : > { %395 = vmatpush1.bf16.msra.mxu0 %v375_v16  ;;  %412 = vmatprep.mubr.bf16.mxu0 %v1287_v0 }
  0xca   : > { %981 = vmatmul.mubr.msk.bf16.vlgmr.msra.gmra.mxu1 %vm316_vm3, %v505_v18  ;;  %975 = vmatprep.subr.msk.bf16.mxu0 %vm320_vm0, %v442_v17 }
  0xcb   : > { %1019 = vmatpush3.bf16.msra.mxu1 %v1126_v26 }
  0xcc   : > { %1020 = vmatprep.subr.bf16.mxu1 %v1127_v27 }
  0xcf   : > { %1021 = vmatpush3.bf16.msra.mxu1 %v1128_v28 }
  0xd0   : > { %971 = vmatmul.mubr.msk.bf16.vlgmr.msra.gmra.mxu0 %vm316_vm3, %v314_v15  ;;  %1022 = vmatprep.subr.bf16.mxu1 %v1129_v29 }
  0xd1   : > { %467 = vmatpush1.bf16.msra.mxu0 %v447_v20  ;;  %484 = vmatprep.mubr.bf16.mxu0 %v1287_v0 }
  0xd2   : > { %985 = vmatprep.subr.msk.bf16.mxu0 %vm320_vm0, %v586_v21 }
  0xd3   : > { %1023 = vmatpush3.bf16.msra.mxu1 %v1130_v30 }
  0xd4   : > { %1024 = vmatprep.subr.bf16.mxu1 %v1131_v31 }
  0xd7   : > { %1025 = vmatpush3.bf16.msra.mxu1 %v1132_v32 }
  0xd8   : > { %976 = vmatmul.mubr.msk.bf16.vlgmr.msra.gmra.mxu0 %vm316_vm3, %v433_v22  ;;  %1026 = vmatprep.subr.bf16.mxu1 %v1133_v33 }
  0xd9   : > { %611 = vmatpush1.bf16.msra.mxu0 %v591_v23  ;;  %628 = vmatprep.mubr.bf16.mxu0 %v1287_v0 }
  0xdb   : > { %1027 = vmatpush3.bf16.msra.mxu1 %v1134_v34 }
  0xdc   : > { %1028 = vmatprep.subr.bf16.mxu1 %v1135_v35 }
  0xdf   : > { %1029 = vmatpush3.bf16.msra.mxu1 %v1136_v36 }
  0xe0   : > { %986 = vmatmul.mubr.msk.bf16.vlgmr.msra.gmra.mxu0 %vm316_vm3, %v577_v24  ;;  %1030 = vmatprep.subr.bf16.mxu1 %v1137_v37 }
  0xe3   : > { %1031 = vmatpush3.bf16.msra.mxu1 %v1138_v38 }
  0xe4   : > { %1032 = vmatprep.subr.bf16.mxu1 %v1139_v39 }
  0xe7   : > { %1033 = vmatpush3.bf16.msra.mxu1 %v1140_v40 }
 0x188   : > { %v358_v41 = vpop.f32.mrf.mxu0 }
 0x18a   : > { %v1044_v42 = vpop.f32.mrf.mxu0  ;;  %v558_v43 = vpop.f32.mrf.mxu1 }
 0x18c   : > { %v361_v44 = vpop.f32.mrf.mxu0  ;;  %v560_v45 = vpop.f32.mrf.mxu1 }
 0x18d   : > { %v1014_v46 = vpack.c.bf16 %v560_v45, %v558_v43 }
 0x18e   : > { %v1045_v47 = vpop.f32.mrf.mxu0  ;;  %v562_v48 = vpop.f32.mrf.mxu1 }
 0x18f   : > { %v572_v49 = vrot.slane %v1014_v46, 6 }
 0x190   : > { %v414_v50 = vpop.f32.mrf.mxu0  ;;  %v563_v51 = vpop.f32.mrf.mxu1 }
 0x191   : > { %574 = vst [vmem:[#allocation2] sm:$0x44] %v572_v49 }
 0x192   : > { %v416_v52 = vpop.f32.mrf.mxu0 }
 0x193   : > { %v1012_v53 = vpack.c.bf16 %v416_v52, %v414_v50 }
 0x194   : > { %v418_v54 = vpop.f32.mrf.mxu0 }
 0x195   : > { %429 = vst [vmem:[#allocation2] sm:$0x11] %v1012_v53 }
 0x196   : > { %v419_v55 = vpop.f32.mrf.mxu0 }
 0x198   : > { %v486_v56 = vpop.f32.mrf.mxu0 }
 0x19a   : > { %v488_v57 = vpop.f32.mrf.mxu0 }
 0x19b   : > { %v1013_v58 = vpack.c.bf16 %v488_v57, %v486_v56 }
 0x19c   : > { %v490_v59 = vpop.f32.mrf.mxu0 }
 0x19d   : > { %v500_v60 = vrot.slane %v1013_v58, 7 }
 0x19e   : > { %v491_v61 = vpop.f32.mrf.mxu0 }
 0x19f   : > { %502 = vst [vmem:[#allocation2] sm:$0x22] %v500_v60 }
 0x1a0   : > { %v630_v62 = vpop.f32.mrf.mxu0 }
 0x1a2   : > { %v632_v63 = vpop.f32.mrf.mxu0 }
 0x1a3   : > { %v1015_v0 = vpack.c.bf16 %v632_v63, %v630_v62 }
 0x1a4   : > { %v634_v1 = vpop.f32.mrf.mxu0 }
 0x1a5   : > { %v644_v2 = vrot.slane %v1015_v0, 5 }
 0x1a6   : > { %v635_v3 = vpop.f32.mrf.mxu0 }
 0x1a7   : > { %646 = vst [vmem:[#allocation2] sm:$0x88] %v644_v2 }
 0x1ae   : > { %v647_v4 = vld [vmem:[#allocation2] sm:$0xff] }
 0x1af   : > { %v989_v5 = vcombine.low %v647_v4, %v647_v4  ;;  %v990_v6 = vcombine.high %v647_v4, %v647_v4 }
 0x1b1   : > { %822 = vmatprep.mubr.bf16.mxu1 %v990_v6 }
 0x1b2   : > { %823 = vmatmul.mubr.bf16.vlgmr.msra.gmra.mxu1 %v989_v5 }
 0x272   : > { %v1034_v7 = vpop.f32.mrf.mxu1 }
 0x274   : > { %v1035_v9 = vpop.f32.mrf.mxu1 }
 0x275   : > { %v1036_v10 = vadd.f32 %v1035_v9, %v1034_v7 }
 0x276   : > { %v1037_v11 = vpop.f32.mrf.mxu1 }
 0x277   : > { %v825_v12 = vadd.f32 %v1036_v10, %v988_v8 }
 0x278   : > { %v1038_v13 = vpop.f32.mrf.mxu1 }
 0x279   : > { %v830_v14 = vadd.f32 %v825_v12, %v358_v41 }
 0x27b   : > { %831 = vst [vmem:[%s296_s11] sm:$0xff] %v830_v14 }
 0x27c   : > { %1210 = shalt.err (!%p1207_p7)
}
 0x27d   : > { %s1211_s13 = scalar_lea.hbm %s845_s10, 128  ;;  %s1215_s14 = scalar_lea.hbm %s1531_s5, 256 }
 0x27e   : > { %p1212_p4 = scmp.ne.s32.totalorder %s845_s10, %s1211_s13  ;;  %p1216_p11 = scmp.lt.s32.totalorder %s845_s10, %s1531_s5 }
 0x27f   : > { %p1217_p10 = scmp.lt.s32.totalorder %s1215_s14, %s1211_s13 }
 0x280   : > { %p1213_p6 = pnand %p1212_p4, %p1411_p13 }
 0x281   : > { %p1218_p8 = por %p1217_p10, %p1216_p11 }
 0x282   : > { %p1214_p9 = pneg %p1213_p6 }
 0x284   : > { %p1219_p1 = pnand %p1218_p8, %p1214_p9 }
 0x286   : > { %1222 = shalt.err (!%p1219_p1)
}
 0x287   : > { %1052 = dma.vmem_to_hbm [thread:$0]  (%p1411_p13), %s848_s16, 128, %s845_s10, %s833_s2  }
 0x288 PF: > { %s859_s15 = sand.u32 1, %s1261_s18   ;;  %p1551_p12 = scmp.ne.s32.totalorder %s1540_s29, 0 }
 0x289   : > { %p1552_p0 = scmp.ge.s32.totalorder %s1281_s23, 2  ;;  %s860_s8 = scalar_lea.sflag [#allocation5], %s859_s15 }
 0x28b   : > { %p1063_p2 = pnand %p1552_p0, %p1551_p12 }
 0x28d   : > { %p1064_p3 = pneg %p1063_p2 }
 0x28f   : > { %1256 = dma.done.wait (%p1064_p3), %s860_s8, 128  }
 0x290   : > { %1258 = vsyncadd (%p1064_p3), %s860_s8, 4294967168  ;;  %s22_s23 = sadd.s32 1, %s1281_s23   ;;  %s1553_s17 = sld [smem:[#allocation12_spill]] }
 0x291   : > { %p19_p5 = scmp.ge.s32.totalorder %s22_s23, 4   ;;  %s1554_s18 = smov %s1265_s19 }
 0x292   : > { %s1555_s19 = smov %s1269_s20  ;;  %s1556_s20 = smov %s1420_s7 }
 0x293   : > { %s1557_s21 = smov %s1277_s22  ;;  %21 = sbr.rel (!%p19_p5) target bundleno = 9 (0x9), region = 95 }
 0x296   : > { %s1558_s22 = smov %s1553_s17 }
 0x298   :  { %865 = vsyncpa [#allocation4], 1 }
 0x299   :  { %867 = vsyncpa [#allocation4 + $0x1], 1 }
 0x29a   :  { %868 = vsyncpa [#allocation7], 1 }
 0x29b   :  { %869 = vsyncpa [#allocation5], 1 }
 0x29c   :  { %871 = vsyncpa [#allocation5 + $0x1], 1 }

</bundles_post_ra>
